<compile_context>
chip_gen: v7x
topology: tpu7x:2x2x1
jax: 0.10.0
libtpu: 0.0.40
codegen_flags: <defaults>
</compile_context>

<pallas_src>
import jax
import jax.numpy as jnp
from jax.experimental import pallas as pl
from jax.experimental.pallas import tpu as pltpu


def _make_affine_kernel(mean: float, inv_std: float):
    # mean / inv_std are closed over as compile-time constants.
    def _affine_kernel(x_ref, o_ref):
        x = x_ref[...].astype(jnp.float32)
        o_ref[...] = ((x - mean) * inv_std).astype(o_ref.dtype)

    return _affine_kernel


# Preferred lane-dense widths (large multiples of 128), tried in order.
_LANE_CANDIDATES = (4096, 2048, 1024, 512, 256, 128)
_TARGET_BLOCK_BYTES = 4 << 20  # ~4 MiB per block


def precomputed_norm(x: jax.Array, mean: float, std: float) -> jax.Array:
    """(x - mean) / std, computed on-TPU with a Pallas kernel.

    x: float array of any shape. mean/std: precomputed Python scalars.
    """
    mean = float(mean)
    inv_std = 1.0 / float(std)

    orig_shape = x.shape
    n = x.size

    # Flatten to a lane-dense 2-D slab (rows, lane).
    lane = None
    for cand in _LANE_CANDIDATES:
        if n % cand == 0:
            lane = cand
            break
    if lane is None:
        # Fallback: keep the original last dim as the lane dim. The block's
        # last dim then equals the full array dim, which satisfies the
        # (8, 128) rule even if it is not a multiple of 128.
        lane = orig_shape[-1]
    rows = n // lane
    x2 = x.reshape(rows, lane)

    # Pick block_rows so one block is ~4 MiB (multiple of 8 sublanes), or the
    # full row extent if that is smaller.
    itemsize = jnp.dtype(x.dtype).itemsize
    block_rows = max(8, (_TARGET_BLOCK_BYTES // (lane * itemsize)) // 8 * 8)
    if block_rows >= rows:
        block_rows = rows

    grid = (pl.cdiv(rows, block_rows),)
    kernel = _make_affine_kernel(mean, inv_std)

    out2 = pl.pallas_call(
        kernel,
        out_shape=jax.ShapeDtypeStruct((rows, lane), x.dtype),
        grid_spec=pl.GridSpec(
            grid=grid,
            in_specs=[pl.BlockSpec((block_rows, lane), lambda i: (i, 0))],
            out_specs=pl.BlockSpec((block_rows, lane), lambda i: (i, 0)),
        ),
        compiler_params=pltpu.CompilerParams(
            dimension_semantics=("parallel",),
            # 2 refs x 2 pipeline buffers x <=4 MiB blocks = <=16 MiB; 32 MiB
            # scoped limit leaves headroom and fits v7x's 64 MiB physical VMEM
            # while lifting v5e's 16 MiB default.
            vmem_limit_bytes=32 << 20,
        ),
    )(x2)

    return out2.reshape(orig_shape)


if __name__ == "__main__":
    # Deterministic synthetic stats (would normally be precomputed over axis=[1,2]).
    MEAN = -4.5
    STD = 3.25

    key = jax.random.PRNGKey(0)
    # Small spectrogram-like input: batch=2, freq=16, time=128.
    x = jax.random.normal(key, (2, 16, 128), dtype=jnp.float32) * 2.0 - 1.0

    out = precomputed_norm(x, MEAN, STD)
    out = jax.block_until_ready(out)

    ref = (x - MEAN) / STD
    assert out.shape == x.shape and out.dtype == x.dtype
    assert jnp.allclose(out, ref, rtol=1e-5, atol=1e-5)

    # Exercise the odd-shape fallback path (lane not a multiple of 128).
    x_odd = jax.random.normal(jax.random.PRNGKey(1), (3, 5, 7), dtype=jnp.float32)
    out_odd = jax.block_until_ready(precomputed_norm(x_odd, MEAN, STD))
    ref_odd = (x_odd - MEAN) / STD
    assert jnp.allclose(out_odd, ref_odd, rtol=1e-5, atol=1e-5)

    print("KERNEL_OK")
</pallas_src>

<mosaic_0001>
module attributes {stable_mosaic.version = 11 : i64} {
  func.func @_affine_kernel(%arg0: i32, %arg1: memref<1x4096xf32, #tpu.memory_space<vmem>>, %arg2: memref<1x4096xf32, #tpu.memory_space<vmem>>) attributes {dimension_semantics = [#tpu.dimension_semantics<parallel>], iteration_bounds = array<i64: 1>, scalar_prefetch = 0 : i64, scratch_operands = 0 : i64, tpu.core_type = #tpu.core_type<tc>, window_params = [{transform_indices = @transform_0, window_bounds = array<i64: 1, 4096>}, {transform_indices = @transform_1, window_bounds = array<i64: 1, 4096>}]} {
    %c0 = arith.constant 0 : index
    %c0_0 = arith.constant 0 : index
    %0 = vector.load %arg1[%c0, %c0_0] : memref<1x4096xf32, #tpu.memory_space<vmem>>, vector<1x4096xf32>
    %cst = arith.constant -4.500000e+00 : f32
    %1 = vector.broadcast %cst : f32 to vector<1x4096xf32>
    %2 = arith.subf %0, %1 : vector<1x4096xf32>
    %cst_1 = arith.constant 0.307692319 : f32
    %3 = vector.broadcast %cst_1 : f32 to vector<1x4096xf32>
    %4 = arith.mulf %2, %3 : vector<1x4096xf32>
    %c0_2 = arith.constant 0 : index
    %c0_3 = arith.constant 0 : index
    %5 = vector.load %arg2[%c0_2, %c0_3] : memref<1x4096xf32, #tpu.memory_space<vmem>>, vector<1x4096xf32>
    tpu.vector_store %arg2[%c0_2, %c0_3], %4 {strides = array<i32>} : memref<1x4096xf32, #tpu.memory_space<vmem>>, vector<1x4096xf32>,
    return
  }
  func.func @transform_0(%arg0: i32) -> (i32, i32) {
    %c0_i32 = arith.constant 0 : i32
    %c0_i32_0 = arith.constant 0 : i32
    return %arg0, %c0_i32 : i32, i32
  }
  func.func @transform_1(%arg0: i32) -> (i32, i32) {
    %c0_i32 = arith.constant 0 : i32
    %c0_i32_0 = arith.constant 0 : i32
    return %arg0, %c0_i32 : i32, i32
  }
}

</mosaic_0001>

<bundles_post_ra>
// kernel: tpu_custom_call.1
= control target key start
LH: loop header
LB: loop body
LE: loop exit
PB: predicated region body
PF: predicated region fallthrough
CT: control target
= control target key end

     0   :  { %6 = vsyncpa [#allocation3], 0  ;;  %s142_s0 = inlined_call_operand.hbm [shape: f32[1,4096], index: 0, kind: input, shape index: {}]   ;;  %s143_s1 = inlined_call_operand.hbm [shape: f32[1,4096], index: 1, kind: output, shape index: {}]  }
   0x1   :  { %7 = vsyncpa [#allocation4], 0  ;;  %s106_s6 = smov [#allocation2]   ;;  %s58_s10 = scalar_lea.hbm %s142_s0, 512 }
   0x2   :  { %s14_s7 = sshll.u32 %s106_s6, 4  ;;  %p59_p0 = scmp.ne.s32.totalorder %s142_s0, %s58_s10  ;;  %s15_s7 = int_to_ptr.vmem [resolvable:$true] %s14_s7 }
   0x3   :  { %p62_p1 = scmp.lt.u32.totalorder %s58_s10, %s142_s0 }
   0x5   :  { %p64_p2 = pnand %p62_p1, %p59_p0 }
   0x7   :  { %67 = shalt.err (!%p64_p2)
}
   0x8   :  { %s68_s15 = scalar_lea.vmem %s15_s7, 512  ;;  %p73_p4 = scmp.lt.s32.totalorder %s15_s7, %s15_s7 }
   0x9   :  { %p69_p3 = scmp.ne.s32.totalorder %s15_s7, %s68_s15  ;;  %p74_p5 = scmp.lt.s32.totalorder %s68_s15, %s68_s15 }
   0xb   :  { %p75_p6 = por %p74_p5, %p73_p4 }
   0xd   :  { %p76_p7 = pnand %p75_p6, %p69_p3 }
   0xf   :  { %79 = shalt.err (!%p76_p7)
}
  0x10   :  { %17 = dma.hbm_to_vmem [thread:$0]  %s142_s0, 512, %s15_s7, [#allocation3]  }
  0x11   :  { %102 = dma.done.wait [#allocation3], 512  }
  0x12   :  { %103 = vsyncadd [#allocation3], 4294966784  ;;  %v21_v0 = vld [vmem:[#allocation2] sm:$0xff]  ;;  %v22_v1 = vld [vmem:[#allocation2 + $0x8] sm:$0xff]  ;;  %s107_s18 = smov [#allocation5]  }
  0x13   :  { %v23_v2 = vld [vmem:[#allocation2 + $0x10] sm:$0xff]  ;;  %v52_v3 = vadd.f32 4.5, %v21_v0  ;;  %v53_v4 = vadd.f32 4.5, %v22_v1  ;;  %v24_v6 = vld [vmem:[#allocation2 + $0x18] sm:$0xff]  ;;  %s43_s19 = sshll.u32 %s107_s18, 4  ;;  %s44_s19 = int_to_ptr.vmem [resolvable:$true] %s43_s19 }
  0x14   :  { %v54_v5 = vadd.f32 4.5, %v23_v2  ;;  %v55_v7 = vadd.f32 4.5, %v24_v6  ;;  %s80_s0 = scalar_lea.vmem %s44_s19, 512  ;;  %p85_p9 = scmp.lt.s32.totalorder %s44_s19, %s44_s19 }
  0x15   :  { %v29_v8 = vmul.f32 0.30769232, %v52_v3  ;;  %v30_v9 = vmul.f32 0.30769232, %v53_v4  ;;  %p81_p8 = scmp.ne.s32.totalorder %s44_s19, %s80_s0  ;;  %p86_p10 = scmp.lt.s32.totalorder %s80_s0, %s80_s0 }
  0x16   :  { %v31_v10 = vmul.f32 0.30769232, %v54_v5  ;;  %v32_v11 = vmul.f32 0.30769232, %v55_v7 }
  0x17   :  { %33 = vst [vmem:[#allocation5] sm:$0xff] %v29_v8  ;;  %34 = vst [vmem:[#allocation5 + $0x8] sm:$0xff] %v30_v9  ;;  %p87_p11 = por %p86_p10, %p85_p9 }
  0x18   :  { %35 = vst [vmem:[#allocation5 + $0x10] sm:$0xff] %v31_v10  ;;  %36 = vst [vmem:[#allocation5 + $0x18] sm:$0xff] %v32_v11 }
  0x19   :  { %p88_p12 = pnand %p87_p11, %p81_p8 }
  0x1b   :  { %91 = shalt.err (!%p88_p12)
}
  0x1c   :  { %s92_s22 = scalar_lea.hbm %s143_s1, 512 }
  0x1d   :  { %p93_p13 = scmp.ne.s32.totalorder %s143_s1, %s92_s22  ;;  %p96_p0 = scmp.lt.u32.totalorder %s92_s22, %s143_s1 }
  0x1f   :  { %p98_p1 = pnand %p96_p0, %p93_p13 }
  0x21   :  { %101 = shalt.err (!%p98_p1)
}
  0x22   :  { %46 = dma.vmem_to_hbm [thread:$0]  %s44_s19, 512, %s143_s1, [#allocation4]  }
  0x23   :  { %104 = dma.done.wait [#allocation4], 512  }
  0x24   :  { %105 = vsyncadd [#allocation4], 4294966784 }
  0x25   :  { %50 = vsyncpa [#allocation3], 1 }
  0x26   :  { %51 = vsyncpa [#allocation4], 1 }

</bundles_post_ra>
